<compile_context>
chip_gen: v6e
topology: v6e:2x2x1
jax: 0.10.0
libtpu: 0.0.40
codegen_flags: <defaults>
</compile_context>

<pallas_src>
import functools
import math

import jax
import jax.numpy as jnp
from jax import lax
from jax.experimental import pallas as pl
from jax.experimental.pallas import tpu as pltpu


def _gelu_tanh(x):
    # GELU, tanh approximation (matches torch.nn.GELU(approximate='tanh')).
    c = math.sqrt(2.0 / math.pi)
    return 0.5 * x * (1.0 + jnp.tanh(c * (x + 0.044715 * x * x * x)))


# --------------------------------------------------------------------------- #
# Kernels
# --------------------------------------------------------------------------- #
def _mlp_kernel_resident(x_ref, wfc_ref, bfc_ref, wproj_ref, bproj_ref, out_ref,
                         *, hc, n_chunks):
    """Weights fully resident in VMEM; hidden dim processed in `hc`-wide chunks."""
    x = x_ref[...].astype(jnp.bfloat16)            # no-op if x is already bf16

    if n_chunks == 1:
        h = jnp.dot(x, wfc_ref[...], preferred_element_type=jnp.float32)
        h = _gelu_tanh(h + bfc_ref[...])           # f32 bias add + GELU (VPU/EUP)
        acc = jnp.dot(h.astype(jnp.bfloat16), wproj_ref[...],
                      preferred_element_type=jnp.float32)
    else:
        def body(k, acc):
            off = pl.multiple_of(k * hc, hc)
            h = jnp.dot(x, wfc_ref[:, pl.ds(off, hc)],
                        preferred_element_type=jnp.float32)
            h = _gelu_tanh(h + bfc_ref[:, pl.ds(off, hc)])
            return acc + jnp.dot(h.astype(jnp.bfloat16),
                                 wproj_ref[pl.ds(off, hc), :],
                                 preferred_element_type=jnp.float32)

        acc = lax.fori_loop(0, n_chunks, body,
                            jnp.zeros(out_ref.shape, jnp.float32), unroll=True)

    out_ref[...] = (acc + bproj_ref[...]).astype(out_ref.dtype)


def _mlp_kernel_tiled(x_ref, wfc_ref, bfc_ref, wproj_ref, bproj_ref, out_ref,
                      acc_ref):
    """Hidden dim tiled on a second ("arbitrary") grid axis; f32 VMEM accumulator."""
    k = pl.program_id(1)

    @pl.when(k == 0)
    def _init():
        acc_ref[...] = jnp.zeros_like(acc_ref)

    x = x_ref[...].astype(jnp.bfloat16)
    h = jnp.dot(x, wfc_ref[...], preferred_element_type=jnp.float32)
    h = _gelu_tanh(h + bfc_ref[...])
    acc_ref[...] += jnp.dot(h.astype(jnp.bfloat16), wproj_ref[...],
                            preferred_element_type=jnp.float32)

    @pl.when(k == pl.num_programs(1) - 1)
    def _finalize():
        out_ref[...] = (acc_ref[...] + bproj_ref[...]).astype(out_ref.dtype)


# --------------------------------------------------------------------------- #
# pallas_call builders
# --------------------------------------------------------------------------- #
def _mlp_resident(x2, w_fc, b_fc, w_proj, b_proj, out_dtype, tm, hc, n_chunks,
                  single_buffer_weights, vmem_limit, cost):
    Mp, C = x2.shape
    H = w_fc.shape[1]

    def const_spec(shape):
        ndim = len(shape)
        index_map = lambda i, _n=ndim: (0,) * _n
        if single_buffer_weights:
            return pl.BlockSpec(shape, index_map, pipeline_mode=pl.Buffered(1))
        return pl.BlockSpec(shape, index_map)

    kernel = functools.partial(_mlp_kernel_resident, hc=hc, n_chunks=n_chunks)
    return pl.pallas_call(
        kernel,
        out_shape=jax.ShapeDtypeStruct((Mp, C), out_dtype),
        grid=(Mp // tm,),
        in_specs=[
            pl.BlockSpec((tm, C), lambda i: (i, 0)),
            const_spec((C, H)),
            const_spec((1, H)),
            const_spec((H, C)),
            const_spec((1, C)),
        ],
        out_specs=pl.BlockSpec((tm, C), lambda i: (i, 0)),
        compiler_params=pltpu.CompilerParams(
            dimension_semantics=("parallel",),
            vmem_limit_bytes=vmem_limit),
        cost_estimate=cost,
    )(x2, w_fc, b_fc, w_proj, b_proj)


def _mlp_tiled(x2, w_fc, b_fc, w_proj, b_proj, out_dtype, tm, th, vmem_limit,
               cost):
    Mp, C = x2.shape
    H = w_fc.shape[1]
    return pl.pallas_call(
        _mlp_kernel_tiled,
        out_shape=jax.ShapeDtypeStruct((Mp, C), out_dtype),
        grid=(Mp // tm, H // th),
        in_specs=[
            pl.BlockSpec((tm, C), lambda i, k: (i, 0)),
            pl.BlockSpec((C, th), lambda i, k: (0, k)),
            pl.BlockSpec((1, th), lambda i, k: (0, k)),
            pl.BlockSpec((th, C), lambda i, k: (k, 0)),
            pl.BlockSpec((1, C), lambda i, k: (0, 0)),
        ],
        out_specs=pl.BlockSpec((tm, C), lambda i, k: (i, 0)),
        scratch_shapes=[pltpu.VMEM((tm, C), jnp.float32)],
        compiler_params=pltpu.CompilerParams(
            dimension_semantics=("parallel", "arbitrary"),
            vmem_limit_bytes=vmem_limit),
        cost_estimate=cost,
    )(x2, w_fc, b_fc, w_proj, b_proj)


# --------------------------------------------------------------------------- #
# Sizing helpers
# --------------------------------------------------------------------------- #
def _vmem_budget_bytes():
    """~85% of this generation's physical VMEM (v5e/v6e: ~108 MiB, v7x: ~54 MiB)."""
    cap = 64 << 20                      # conservative default if the query fails
    try:
        info = pltpu.get_tpu_info()
        cap = int(getattr(info, "vmem_capacity_bytes", cap))
    except Exception:                   # config probe only; never masks lowering
        pass
    return int(cap * 0.85)


def _largest_dividing_chunk(h, target):
    """Largest multiple of 128 that divides h and is <= target (falls back to h)."""
    if h <= target:
        return h
    cand = (min(target, h) // 128) * 128
    while cand >= 128:
        if h % cand == 0:
            return cand
        cand -= 128
    return h


def _choose_tm(m, c, per_row_extra, block_rows, budget_left):
    """Row tile: large (amortizes per-grid-step overhead and the MXU weight
    re-push), 128-aligned when possible, capped by the VMEM left after weights,
    and guaranteeing >= 2 row tiles so megacore / both v7x TCs get work."""
    tm = min(block_rows, max(m, 8))
    # bytes/row: f32 x (2 bufs) + bf16 x copy + out (2 bufs) + f32 acc + temps
    per_row = c * (2 * 4 + 2 + 2 * 4 + 4) + per_row_extra
    if budget_left > 0:
        tm = min(tm, max(8, int(budget_left) // max(per_row, 1)))
    if tm >= 128:
        tm = (tm // 128) * 128
    else:
        tm = max(8, (tm // 8) * 8)
    if m > 16 and tm >= m:
        half = -(-m // 2)
        tm = max(8, -(-half // 8) * 8)
    return tm


def _pad_rows(x2, tm):
    m = x2.shape[0]
    mp = -(-m // tm) * tm
    if mp != m:
        x2 = jnp.pad(x2, ((0, mp - m), (0, 0)))
    return x2, mp


# --------------------------------------------------------------------------- #
# Public wrapper
# --------------------------------------------------------------------------- #
def mlp_forward(x, params, *, block_rows=512, hidden_chunk=1024, out_dtype=None,
                force_tiled=False, tile_h=None):
    """x: (..., C) float32 or bfloat16.
    params: w_fc (C,4C), b_fc (1,4C), w_proj (4C,C), b_proj (1,C)
    (linear weights pre-transposed to (in, out) relative to torch nn.Linear)."""
    orig_shape = x.shape
    C = orig_shape[-1]
    x2 = x.reshape(-1, C)
    M = x2.shape[0]
    H = params["w_fc"].shape[1]
    out_dtype = x.dtype if out_dtype is None else jnp.dtype(out_dtype)

    # bf16 weights for the MXU (halves resident VMEM + weight DMA); biases f32.
    # x is deliberately NOT cast in the wrapper (that would be a separate
    # un-fused XLA pass); the kernel casts per tile, or skips it for bf16 inputs.
    w_fc = params["w_fc"].astype(jnp.bfloat16)
    w_proj = params["w_proj"].astype(jnp.bfloat16)
    b_fc = params["b_fc"].astype(jnp.float32).reshape(1, H)
    b_proj = params["b_proj"].astype(jnp.float32).reshape(1, C)

    budget = _vmem_budget_bytes()
    w_bytes = 4 * C * H                     # both bf16 weight matrices
    bias_bytes = 4 * (H + C)
    x_item = jnp.dtype(x2.dtype).itemsize
    o_item = jnp.dtype(out_dtype).itemsize

    def cost_for(mp):
        return pl.CostEstimate(
            flops=4 * mp * C * H,           # two matmuls, 2*M*C*H each
            transcendentals=mp * H,         # one tanh per hidden element
            bytes_accessed=mp * C * (x_item + o_item) + w_bytes + bias_bytes)

    def run_resident(single_buffer):
        wbuf = 1 if single_buffer else 2
        hc = _largest_dividing_chunk(H, min(hidden_chunk, H))
        n_chunks = H // hc
        tm = _choose_tm(M, C, hc * 6, block_rows,
                        budget - wbuf * (w_bytes + bias_bytes))
        x2p, mp = _pad_rows(x2, tm)
        est = (wbuf * (w_bytes + bias_bytes)
               + 2 * tm * C * (x_item + o_item)   # double-buffered x / out tiles
               + tm * C * (2 + 4)                 # bf16 x copy + f32 accumulator
               + tm * hc * 6)                     # hidden chunk (f32 + bf16)
        vmem_limit = int(min(max(2 * est, 16 << 20), budget))
        out = _mlp_resident(x2p, w_fc, b_fc, w_proj, b_proj, out_dtype, tm, hc,
                            n_chunks, single_buffer, vmem_limit, cost_for(mp))
        return out[:M]

    def run_tiled():
        th = tile_h if tile_h is not None else _largest_dividing_chunk(
            H, max(128, int(budget) // (32 * C)))
        wblk_bytes = 2 * (4 * C * th + 4 * th)    # dbl-buffered bf16 W blocks + b_fc
        tm = _choose_tm(M, C, th * 6, block_rows, budget - wblk_bytes - 4 * C)
        x2p, mp = _pad_rows(x2, tm)
        est = (wblk_bytes + 4 * C
               + 2 * tm * C * (x_item + o_item)
               + tm * C * (2 + 4)
               + tm * th * 6)
        vmem_limit = int(min(max(2 * est, 16 << 20), budget))
        out = _mlp_tiled(x2p, w_fc, b_fc, w_proj, b_proj, out_dtype, tm, th,
                         vmem_limit, cost_for(mp))
        return out[:M]

    if force_tiled or w_bytes > 0.45 * budget:
        out2 = run_tiled()
    else:
        try:
            out2 = run_resident(True)
        except (TypeError, ValueError, NotImplementedError,
                pltpu.LoweringException):
            # pl.Buffered(1) single-buffering unavailable: weights become
            # double-buffered, so re-check the budget (switch to the H-tiled
            # path or re-derive tm) instead of silently doubling the working set.
            if 2 * w_bytes > 0.45 * budget:
                out2 = run_tiled()
            else:
                out2 = run_resident(False)

    return out2.reshape(orig_shape)


# ---------------- pure-JAX references (silent correctness checks) ------------ #
def _ref_mlp_f32(x, params):
    h = _gelu_tanh(x @ params["w_fc"] + params["b_fc"])
    return h @ params["w_proj"] + params["b_proj"]


def _ref_mlp_bf16(x, params):
    # Same precision policy as the kernel: bf16 matmul operands, f32 accumulation.
    h = jnp.dot(x.astype(jnp.bfloat16), params["w_fc"].astype(jnp.bfloat16),
                preferred_element_type=jnp.float32) + params["b_fc"]
    h = _gelu_tanh(h)
    return jnp.dot(h.astype(jnp.bfloat16), params["w_proj"].astype(jnp.bfloat16),
                   preferred_element_type=jnp.float32) + params["b_proj"]


if __name__ == "__main__":
    # Small GPT-2-style config: lane-dense C (multiple of 128), hidden = 4C.
    B, T, C = 2, 64, 128
    H = 4 * C

    key = jax.random.PRNGKey(0)
    k1, k2, k3, k4, k5 = jax.random.split(key, 5)

    def nrm(k, shape, scale=0.02):
        return (scale * jax.random.normal(k, shape)).astype(jnp.float32)

    params = {
        "w_fc": nrm(k1, (C, H)),      # (in, out): pre-transposed nn.Linear weight
        "b_fc": nrm(k2, (1, H)),
        "w_proj": nrm(k3, (H, C)),
        "b_proj": nrm(k4, (1, C)),
    }
    x = jax.random.normal(k5, (B, T, C), dtype=jnp.float32)

    ref_bf16 = _ref_mlp_bf16(x, params)   # same bf16-matmul / f32-accum policy
    ref_f32 = _ref_mlp_f32(x, params)

    def check(out, name):
        assert out.shape == x.shape, name
        assert jnp.allclose(out, ref_bf16, atol=1e-3, rtol=1e-3), \
            f"{name}: mismatch vs matched-precision reference"
        assert jnp.allclose(out, ref_f32, atol=2e-2, rtol=2e-2), \
            f"{name}: mismatch vs f32 reference"

    # 1) Default path: VMEM-resident weights, rows-only grid (2 tiles of 64 rows).
    check(jax.block_until_ready(mlp_forward(x, params)), "resident")

    # 2) Resident path with in-kernel hidden-dim chunking (4 chunks of 128).
    check(jax.block_until_ready(
        mlp_forward(x, params, block_rows=64, hidden_chunk=128)),
        "resident-chunked")

    # 3) H-tiled fallback (what a large-C config takes on v7x's 64 MiB VMEM).
    check(jax.block_until_ready(
        mlp_forward(x, params, block_rows=64, force_tiled=True, tile_h=128)),
        "tiled")

    print("KERNEL_OK")
</pallas_src>

<mosaic_0001>
module attributes {stable_mosaic.version = 11 : i64} {
  func.func @_mlp_kernel_resident(%arg0: i32, %arg1: memref<64x128xf32, #tpu.memory_space<vmem>>, %arg2: memref<128x512xbf16, #tpu.memory_space<vmem>>, %arg3: memref<1x512xf32, #tpu.memory_space<vmem>>, %arg4: memref<512x128xbf16, #tpu.memory_space<vmem>>, %arg5: memref<1x128xf32, #tpu.memory_space<vmem>>, %arg6: memref<64x128xf32, #tpu.memory_space<vmem>>) attributes {dimension_semantics = [#tpu.dimension_semantics<parallel>], iteration_bounds = array<i64: 2>, scalar_prefetch = 0 : i64, scratch_operands = 0 : i64, tpu.core_type = #tpu.core_type<tc>, window_params = [{transform_indices = @transform_0, window_bounds = array<i64: 64, 128>}, {pipeline_mode = #tpu.pipeline_mode<synchronous>, transform_indices = @transform_1, window_bounds = array<i64: 128, 512>}, {pipeline_mode = #tpu.pipeline_mode<synchronous>, transform_indices = @transform_2, window_bounds = array<i64: 1, 512>}, {pipeline_mode = #tpu.pipeline_mode<synchronous>, transform_indices = @transform_3, window_bounds = array<i64: 512, 128>}, {pipeline_mode = #tpu.pipeline_mode<synchronous>, transform_indices = @transform_4, window_bounds = array<i64: 1, 128>}, {transform_indices = @transform_5, window_bounds = array<i64: 64, 128>}]} {
    %c0 = arith.constant 0 : index
    %c0_0 = arith.constant 0 : index
    %0 = vector.load %arg1[%c0, %c0_0] : memref<64x128xf32, #tpu.memory_space<vmem>>, vector<64x128xf32>
    %1 = arith.truncf %0 : vector<64x128xf32> to vector<64x128xbf16>
    %c0_1 = arith.constant 0 : index
    %c0_2 = arith.constant 0 : index
    %2 = vector.load %arg2[%c0_1, %c0_2] : memref<128x512xbf16, #tpu.memory_space<vmem>>, vector<128x512xbf16>
    %cst = arith.constant dense<0.000000e+00> : vector<64x512xf32>
    %3 = tpu.matmul %1, %2, %cst {dimension_numbers = #tpu.dot_dimension_numbers<[1], [0], [0], [1], [0, 0, 1, 1], [], []>} : vector<64x128xbf16>, vector<128x512xbf16>, vector<64x512xf32> -> vector<64x512xf32>
    %c0_3 = arith.constant 0 : index
    %c0_4 = arith.constant 0 : index
    %4 = vector.load %arg3[%c0_3, %c0_4] : memref<1x512xf32, #tpu.memory_space<vmem>>, vector<1x512xf32>
    %5 = vector.broadcast %4 : vector<1x512xf32> to vector<64x512xf32>
    %6 = arith.addf %3, %5 : vector<64x512xf32>
    %cst_5 = arith.constant 5.000000e-01 : f32
    %7 = vector.broadcast %cst_5 : f32 to vector<64x512xf32>
    %8 = arith.mulf %7, %6 : vector<64x512xf32>
    %cst_6 = arith.constant 4.471500e-02 : f32
    %9 = vector.broadcast %cst_6 : f32 to vector<64x512xf32>
    %10 = arith.mulf %9, %6 : vector<64x512xf32>
    %11 = arith.mulf %10, %6 : vector<64x512xf32>
    %12 = arith.mulf %11, %6 : vector<64x512xf32>
    %13 = arith.addf %6, %12 : vector<64x512xf32>
    %cst_7 = arith.constant 0.797884583 : f32
    %14 = vector.broadcast %cst_7 : f32 to vector<64x512xf32>
    %15 = arith.mulf %14, %13 : vector<64x512xf32>
    %16 = math.tanh %15 : vector<64x512xf32>
    %cst_8 = arith.constant 1.000000e+00 : f32
    %17 = vector.broadcast %cst_8 : f32 to vector<64x512xf32>
    %18 = arith.addf %17, %16 : vector<64x512xf32>
    %19 = arith.mulf %8, %18 : vector<64x512xf32>
    %20 = arith.truncf %19 : vector<64x512xf32> to vector<64x512xbf16>
    %c0_9 = arith.constant 0 : index
    %c0_10 = arith.constant 0 : index
    %21 = vector.load %arg4[%c0_9, %c0_10] : memref<512x128xbf16, #tpu.memory_space<vmem>>, vector<512x128xbf16>
    %cst_11 = arith.constant dense<0.000000e+00> : vector<64x128xf32>
    %22 = tpu.matmul %20, %21, %cst_11 {dimension_numbers = #tpu.dot_dimension_numbers<[1], [0], [0], [1], [0, 0, 1, 1], [], []>} : vector<64x512xbf16>, vector<512x128xbf16>, vector<64x128xf32> -> vector<64x128xf32>
    %c0_12 = arith.constant 0 : index
    %c0_13 = arith.constant 0 : index
    %23 = vector.load %arg5[%c0_12, %c0_13] : memref<1x128xf32, #tpu.memory_space<vmem>>, vector<1x128xf32>
    %24 = vector.broadcast %23 : vector<1x128xf32> to vector<64x128xf32>
    %25 = arith.addf %22, %24 : vector<64x128xf32>
    %c0_14 = arith.constant 0 : index
    %c0_15 = arith.constant 0 : index
    %26 = vector.load %arg6[%c0_14, %c0_15] : memref<64x128xf32, #tpu.memory_space<vmem>>, vector<64x128xf32>
    tpu.vector_store %arg6[%c0_14, %c0_15], %25 {strides = array<i32>} : memref<64x128xf32, #tpu.memory_space<vmem>>, vector<64x128xf32>,
    return
  }
  func.func @transform_0(%arg0: i32) -> (i32, i32) {
    %c0_i32 = arith.constant 0 : i32
    %c0_i32_0 = arith.constant 0 : i32
    return %arg0, %c0_i32 : i32, i32
  }
  func.func @transform_1(%arg0: i32) -> (i32, i32) {
    %c0_i32 = arith.constant 0 : i32
    %c0_i32_0 = arith.constant 0 : i32
    %c0_i32_1 = arith.constant 0 : i32
    return %c0_i32, %c0_i32_0 : i32, i32
  }
  func.func @transform_2(%arg0: i32) -> (i32, i32) {
    %c0_i32 = arith.constant 0 : i32
    %c0_i32_0 = arith.constant 0 : i32
    %c0_i32_1 = arith.constant 0 : i32
    return %c0_i32, %c0_i32_0 : i32, i32
  }
  func.func @transform_3(%arg0: i32) -> (i32, i32) {
    %c0_i32 = arith.constant 0 : i32
    %c0_i32_0 = arith.constant 0 : i32
    %c0_i32_1 = arith.constant 0 : i32
    return %c0_i32, %c0_i32_0 : i32, i32
  }
  func.func @transform_4(%arg0: i32) -> (i32, i32) {
    %c0_i32 = arith.constant 0 : i32
    %c0_i32_0 = arith.constant 0 : i32
    %c0_i32_1 = arith.constant 0 : i32
    return %c0_i32, %c0_i32_0 : i32, i32
  }
  func.func @transform_5(%arg0: i32) -> (i32, i32) {
    %c0_i32 = arith.constant 0 : i32
    %c0_i32_0 = arith.constant 0 : i32
    return %arg0, %c0_i32 : i32, i32
  }
}

</mosaic_0001>

<bundles_post_ra>
// kernel: tpu_custom_call.1
= control target key start
LH: loop header
LB: loop body
LE: loop exit
PB: predicated region body
PF: predicated region fallthrough
CT: control target
= control target key end

     0   :  { %10 = vsyncpa [#allocation3], 0  ;;  %s2713_s0 = inlined_call_operand.hbm [shape: f32[128,128], index: 0, kind: input, shape index: {}]   ;;  %s2714_s1 = inlined_call_operand.hbm [shape: bf16[128,512], index: 1, kind: input, shape index: {}]   ;;  %s2715_s2 = inlined_call_operand.hbm [shape: f32[1,512], index: 2, kind: input, shape index: {}]   ;;  %s2716_s3 = inlined_call_operand.hbm [shape: bf16[512,128], index: 3, kind: input, shape index: {}]   ;;  %s2717_s4 = inlined_call_operand.vmem [shape: f32[1,128], index: 4, kind: input, shape index: {}]   ;;  %s2718_s5 = inlined_call_operand.hbm [shape: f32[128,128], index: 5, kind: output, shape index: {}]  }
   0x1   :  { %12 = vsyncpa [#allocation3 + $0x1], 0 }
   0x2   :  { %13 = vsyncpa [#allocation6], 0 }
   0x3   :  { %14 = vsyncpa [#allocation9], 0 }
   0x4   :  { %15 = vsyncpa [#allocation4], 0 }
   0x5   :  { %17 = vsyncpa [#allocation4 + $0x1], 0  ;;  %s2102_s18 = smov 0   ;;  %s2104_s19 = smov 0  }
   0x6   :  { %s2106_s20 = smov 0   ;;  %s2108_s21 = smov 0  }
   0x7 LB: > { %s2123_s22 = sadd.s32 4294967295, %s2056_s21   ;;  %s1481_s23 = sadd.s32 4294967294, %s2056_s21   ;;  %s2056_s21 = sphi %s2108_s21, %s2772_s21   ;;  %s2052_s20 = sphi %s2106_s20, %s2771_s20   ;;  %s2048_s19 = sphi %s2104_s19, %s2770_s19   ;;  %s2044_s18 = sphi %s2102_s18, %s2769_s18  }
   0x8   : > { %p43_p0 = scmp.ne.s32.totalorder %s2048_s19, %s2044_s18  ;;  %p2719_p1 = scmp.eq.s32.totalorder %s2123_s22, 0 }
   0x9   : > { %p157_p3 = scmp.eq.s32.totalorder %s1481_s23, 1  ;;  %p1482_p5 = scmp.ge.s32.totalorder %s2056_s21, 1 }
   0xa   : > { %p2132_p4 = por %p2719_p1, %p43_p0  ;;  %p164_p7 = scmp.lt.s32.totalorder %s2056_s21, 3 }
   0xb   : > { %p2137_p6 = por %p157_p3, %p43_p0  ;;  %s2058_s27 = smov [#allocation5]  }
   0xc   : > { %s2731_s24 = scalar_select %p2132_p4, 1, 0 }
   0xd   : > { %s2732_s25 = scalar_select %p2137_p6, 1, 0 }
   0xe   : > { %p2142_p8 = pnand %p1482_p5, %p164_p7  ;;  %s176_s28 = sshll.u32 %s2058_s27, 4  ;;  %s177_s28 = int_to_ptr.vmem [resolvable:$true] %s176_s28 }
   0xf   : > { %s2059_s30 = smov [#allocation7]   ;;  %s2060_s7 = smov [#allocation8]  }
  0x10   : > { %s2733_s26 = scalar_select %p2142_p8, 1, 0 }
  0x11   : > { %p1664_p9 = pneg %p2142_p8  ;;  %s190_s6 = sshll.u32 %s2059_s30, 4  ;;  %s191_s6 = int_to_ptr.vmem [resolvable:$true] %s190_s6 }
  0x12   : > { %s200_s8 = sshll.u32 %s2060_s7, 4  ;;  %s1889_s9 = scalar_lea.vmem %s177_s28, 4096  ;;  %s201_s8 = int_to_ptr.vmem [resolvable:$true] %s200_s8 }
  0x13   : > { %p2151_p11 = pnand %p1664_p9, %p2719_p1  ;;  %p1890_p13 = scmp.ne.s32.totalorder %s177_s28, %s1889_s9 }
  0x14   : > { %p1897_p5 = scmp.lt.s32.totalorder %s177_s28, %s177_s28  ;;  %p1898_p7 = scmp.lt.s32.totalorder %s1889_s9, %s1889_s9 }
  0x15   : > { %p1880_p12 = pneg %p2151_p11 }
  0x16   : > { %p1899_p9 = por %p1898_p7, %p1897_p5 }
  0x17   : > { %p1892_p0 = pnand %p1890_p13, %p1880_p12 }
  0x19   : > { %p1893_p3 = pneg %p1892_p0 }
  0x1b   : > { %p1900_p10 = pnand %p1899_p9, %p1893_p3 }
  0x1d   : > { %1903 = shalt.err (!%p1900_p10)
}
  0x1e   : > { %s2061_s10 = smov 256   ;;  %s2062_s11 = smov 16  }
  0x1f   : > { %1667 = dma.hbm_to_vmem [thread:$0]  (!%p2151_p11), %s2714_s1, 4096, %s177_s28, [#allocation6], %s2061_s10, %s2061_s10, %s2062_s11  }
  0x20   : > { %s1915_s14 = scalar_lea.vmem %s191_s6, 64  ;;  %p1923_p2 = scmp.lt.s32.totalorder %s191_s6, %s191_s6 }
  0x21   : > { %p1916_p1 = scmp.ne.s32.totalorder %s191_s6, %s1915_s14  ;;  %p1924_p6 = scmp.lt.s32.totalorder %s1915_s14, %s1915_s14 }
  0x23   : > { %p1918_p13 = pnand %p1916_p1, %p1880_p12  ;;  %p1925_p5 = por %p1924_p6, %p1923_p2 }
  0x25   : > { %p1919_p0 = pneg %p1918_p13 }
  0x27   : > { %p1926_p3 = pnand %p1925_p5, %p1919_p0 }
  0x29   : > { %1929 = shalt.err (!%p1926_p3)
}
  0x2a   : > { %1670 = dma.hbm_to_vmem [thread:$0]  (!%p2151_p11), %s2715_s2, 64, %s191_s6, [#allocation6]  }
  0x2b   : > { %s1941_s17 = scalar_lea.vmem %s201_s8, 4096  ;;  %p1949_p9 = scmp.lt.s32.totalorder %s201_s8, %s201_s8 }
  0x2c   : > { %p1942_p10 = scmp.ne.s32.totalorder %s201_s8, %s1941_s17  ;;  %p1950_p13 = scmp.lt.s32.totalorder %s1941_s17, %s1941_s17 }
  0x2e   : > { %p1944_p7 = pnand %p1942_p10, %p1880_p12  ;;  %p1951_p4 = por %p1950_p13, %p1949_p9 }
  0x30   : > { %p1945_p1 = pneg %p1944_p7 }
  0x32   : > { %p1952_p2 = pnand %p1951_p4, %p1945_p1 }
  0x34   : > { %1955 = shalt.err (!%p1952_p2)
}
  0x35   : > { %s2063_s23 = smov 64   ;;  %s2064_s27 = smov 4  }
  0x36   : > { %1673 = dma.hbm_to_vmem [thread:$0]  (!%p2151_p11), %s2716_s3, 4096, %s201_s8, [#allocation9], %s2063_s23, %s2063_s23, %s2064_s27  }
  0x37   : > { %s2182_s6 = sadd.s32 1, %s2056_s21   ;;  %s30_s9 = sadd.s32 1, %s2052_s20 }
  0x38   : > { %s27_s7 = ssub.s32 %s2056_s21, %s2182_s6  ;;  %p37_p6 = scmp.ne.s32.totalorder %s2052_s20, %s2048_s19 }
  0x39   : > { %p28_p4 = scmp.eq.s32.totalorder %s27_s7, 0  ;;  %p38_p12 = scmp.eq.s32.totalorder %s2056_s21, 0 }
  0x3a   : > { %p1685_p0 = scmp.lt.s32.totalorder %s2056_s21, 2  ;;  %p2735_p3 = scmp.eq.s32.totalorder %s2123_s22, 1 }
  0x3b   : > { %s2192_s10 = scalar_select %p28_p4, %s2052_s20, %s30_s9  }
  0x3c   : > { %p39_p5 = por %p38_p12, %p37_p6  ;;  %p2196_p10 = por %p2735_p3, %p37_p6 }
  0x3d   : > { %s217_s29 = sand.u32 1, %s2052_s20   ;;  %s1566_s12 = sshll.u32 %s2056_s21, 10 }
  0x3e   : > { %s2736_s11 = scalar_select %p2196_p10, 1, 0 }
  0x3f   : > { %s1487_s8 = sshll.u32 %s217_s29, 6  ;;  %s2205_s15 = scalar_lea.hbm %s2713_s0, %s1566_s12 }
  0x40   : > { %s221_s16 = scalar_lea.vmem [#allocation2], %s1487_s8  ;;  %p2207_p11 = pnand %p1685_p0, %p39_p5 }
  0x41   : > { %s228_s17 = sshll.u32 %s221_s16, 4  ;;  %s2213_s27 = scalar_lea.sflag [#allocation3], %s217_s29  ;;  %s2211_s17 = int_to_ptr.vmem [resolvable:$true] %s228_s17 }
  0x42   : > { %s1956_s28 = scalar_lea.hbm %s2205_s15, 1024  ;;  %p1958_p1 = pneg %p2207_p11 }
  0x43   : > { %p1957_p7 = scmp.ne.s32.totalorder %s2205_s15, %s1956_s28  ;;  %s1961_s9 = scalar_lea.hbm %s2713_s0, 2048 }
  0x44   : > { %p1962_p2 = scmp.lt.s32.totalorder %s2205_s15, %s2713_s0  ;;  %p1963_p4 = scmp.lt.s32.totalorder %s1961_s9, %s1956_s28 }
  0x45   : > { %p1959_p9 = pnand %p1958_p1, %p1957_p7 }
  0x46   : > { %p1964_p6 = por %p1963_p4, %p1962_p2 }
  0x47   : > { %p1960_p13 = pneg %p1959_p9 }
  0x49   : > { %p1965_p12 = pnand %p1964_p6, %p1960_p13 }
  0x4b   : > { %1968 = shalt.err (!%p1965_p12)
}
  0x4c   : > { %s1969_s29 = scalar_lea.vmem %s2211_s17, 1024  ;;  %s2065_s13 = smov [#allocation2]  }
  0x4d   : > { %p1970_p0 = scmp.ne.s32.totalorder %s2211_s17, %s1969_s29  ;;  %s1974_s14 = sshll.u32 %s2065_s13, 4  ;;  %s1975_s14 = int_to_ptr.vmem [resolvable:$false] %s1974_s14 }
  0x4e   : > { %s1976_s16 = scalar_lea.vmem %s1975_s14, 2048  ;;  %p1977_p7 = scmp.lt.s32.totalorder %s2211_s17, %s1975_s14 }
  0x4f   : > { %p1972_p5 = pnand %p1970_p0, %p1958_p1  ;;  %p1978_p9 = scmp.lt.s32.totalorder %s1976_s16, %s1969_s29 }
  0x51   : > { %p1973_p3 = pneg %p1972_p5  ;;  %p1979_p10 = por %p1978_p9, %p1977_p7 }
  0x53   : > { %p1980_p8 = pnand %p1979_p10, %p1973_p3 }
  0x55   : > { %1983 = shalt.err (!%p1980_p8)
}
  0x56   : > { %s2066_s28 = smov 128   ;;  %s2067_s30 = smov 8  }
  0x57   : > { %1677 = dma.hbm_to_vmem [thread:$0]  (!%p2207_p11), %s2205_s15, 1024, %s2211_s17, %s2213_s27, %s2066_s28, %s2066_s28, %s2067_s30  }
  0x58   : > { %p2738_p1 = scmp.ne.s32.totalorder %s2733_s26, 0 }
  0x5a   : > { %240 = sbr.rel (%p2738_p1) target bundleno = 648 (0x288), region = 40 }
  0x5f   : > { %s2237_s7 = sand.u32 1, %s2048_s19   ;;  %p2739_p8 = scmp.ne.s32.totalorder %s2731_s24, 0 }
  0x60   : > { %s1491_s9 = sshll.u32 %s2237_s7, 6  ;;  %s243_s12 = scalar_lea.sflag [#allocation3], %s2237_s7 }
  0x61   : > { %s2243_s8 = scalar_lea.vmem [#allocation2], %s1491_s9 }
  0x62   : > { %2027 = dma.done.wait (%p2739_p8), %s243_s12, 1024  }
  0x63   : > { %2029 = vsyncadd (%p2739_p8), %s243_s12, 4294966272  ;;  %p2740_p10 = scmp.eq.s32.totalorder %s2123_s22, 0 }
  0x65   : > { %2031 = dma.done.wait (%p2740_p10), [#allocation6], 4160   ;;  %p2741_p11 = pmov %p2740_p10 }
  0x66   : > { %p2742_p13 = pmov %p2740_p10 }
  0x67   : > { %2033 = vsyncadd (%p2741_p11), [#allocation6], 4294963136 }
  0x68   : > { %2035 = dma.done.wait (%p2742_p13), [#allocation9], 4096   ;;  %p2743_p2 = pmov %p2740_p10 }
  0x69   : > { %v2068_v0 = vmov 0   ;;  %v1734_v1 = vld [vmem:[#allocation5 + $0xe4] ss:$16 sps:$4 sm:$0xff]   ;;  %v1736_v2 = vld [vmem:[#allocation5 + $0xec] ss:$16 sps:$4 sm:$0xff]   ;;  %s2647_s15 = scalar_lea.vmem [#allocation10], %s1491_s9 }
  0x6a   : > { %2037 = vsyncadd (%p2743_p2), [#allocation9], 4294963200  ;;  %546 = vmatprep.mubr.bf16.mxu0 %v2068_v0  ;;  %619 = vmatprep.mubr.bf16.mxu1 %v2068_v0  ;;  %v1738_v3 = vld [vmem:[#allocation5 + $0xe0] ss:$16 sps:$4 sm:$0xff]   ;;  %v1739_v4 = vld [vmem:[#allocation5 + $0xe8] ss:$16 sps:$4 sm:$0xff]  }
  0x6b   : > { %514 = vmatprep.subr.bf16.mxu0 %v1734_v1  ;;  %587 = vmatprep.subr.bf16.mxu1 %v1736_v2  ;;  %v1740_v5 = vld [vmem:[#allocation5 + $0xc4] ss:$16 sps:$4 sm:$0xff]   ;;  %v1742_v6 = vld [vmem:[#allocation5 + $0xcc] ss:$16 sps:$4 sm:$0xff]   ;;  %v1744_v7 = vld [vmem:[#allocation5 + $0xc0] ss:$16 sps:$4 sm:$0xff]  }
  0x6c   : > { %515 = vmatpush1.bf16.msra.mxu0 %v1738_v3  ;;  %588 = vmatpush1.bf16.msra.mxu1 %v1739_v4  ;;  %v1745_v8 = vld [vmem:[#allocation5 + $0xc8] ss:$16 sps:$4 sm:$0xff]   ;;  %v1746_v9 = vld [vmem:[#allocation5 + $0xa4] ss:$16 sps:$4 sm:$0xff]   ;;  %v1748_v10 = vld [vmem:[#allocation5 + $0xac] ss:$16 sps:$4 sm:$0xff]  }
  0x6d   : > { %516 = vmatprep.subr.bf16.mxu0 %v1740_v5  ;;  %589 = vmatprep.subr.bf16.mxu1 %v1742_v6  ;;  %v1750_v11 = vld [vmem:[#allocation5 + $0xa0] ss:$16 sps:$4 sm:$0xff]   ;;  %v1751_v12 = vld [vmem:[#allocation5 + $0xa8] ss:$16 sps:$4 sm:$0xff]   ;;  %v1752_v13 = vld [vmem:[#allocation5 + $0x84] ss:$16 sps:$4 sm:$0xff]  }
  0x6e   : > { %v1754_v14 = vld [vmem:[#allocation5 + $0x8c] ss:$16 sps:$4 sm:$0xff]   ;;  %v1756_v15 = vld [vmem:[#allocation5 + $0x80] ss:$16 sps:$4 sm:$0xff]   ;;  %v1757_v16 = vld [vmem:[#allocation5 + $0x88] ss:$16 sps:$4 sm:$0xff]  }
  0x6f   : > { %v1758_v17 = vld [vmem:[#allocation5 + $0x64] ss:$16 sps:$4 sm:$0xff]   ;;  %v1760_v18 = vld [vmem:[#allocation5 + $0x6c] ss:$16 sps:$4 sm:$0xff]   ;;  %v1762_v19 = vld [vmem:[#allocation5 + $0x60] ss:$16 sps:$4 sm:$0xff]  }
  0x70   : > { %517 = vmatpush1.bf16.msra.mxu0 %v1744_v7  ;;  %590 = vmatpush1.bf16.msra.mxu1 %v1745_v8  ;;  %v1763_v20 = vld [vmem:[#allocation5 + $0x68] ss:$16 sps:$4 sm:$0xff]   ;;  %v1764_v21 = vld [vmem:[#allocation5 + $0x44] ss:$16 sps:$4 sm:$0xff]   ;;  %v1766_v22 = vld [vmem:[#allocation5 + $0x4c] ss:$16 sps:$4 sm:$0xff]  }
  0x71   : > { %518 = vmatprep.subr.bf16.mxu0 %v1746_v9  ;;  %591 = vmatprep.subr.bf16.mxu1 %v1748_v10  ;;  %v1768_v23 = vld [vmem:[#allocation5 + $0x40] ss:$16 sps:$4 sm:$0xff]   ;;  %v1769_v24 = vld [vmem:[#allocation5 + $0x48] ss:$16 sps:$4 sm:$0xff]   ;;  %v1770_v25 = vld [vmem:[#allocation5 + $0x24] ss:$16 sps:$4 sm:$0xff]  }
  0x72   : > { %v1772_v26 = vld [vmem:[#allocation5 + $0x2c] ss:$16 sps:$4 sm:$0xff]   ;;  %v1774_v27 = vld [vmem:[#allocation5 + $0x20] ss:$16 sps:$4 sm:$0xff]   ;;  %v1775_v28 = vld [vmem:[#allocation5 + $0x28] ss:$16 sps:$4 sm:$0xff]  }
  0x73   : > { %v1776_v29 = vld [vmem:[#allocation5 + $0x4] ss:$16 sps:$4 sm:$0xff]   ;;  %v1778_v30 = vld [vmem:[#allocation5 + $0xc] ss:$16 sps:$4 sm:$0xff]   ;;  %v1780_v31 = vld [vmem:[#allocation5] ss:$16 sps:$4 sm:$0xff]  }
  0x74   : > { %519 = vmatpush1.bf16.msra.mxu0 %v1750_v11  ;;  %592 = vmatpush1.bf16.msra.mxu1 %v1751_v12  ;;  %v1781_v32 = vld [vmem:[#allocation5 + $0x8] ss:$16 sps:$4 sm:$0xff]   ;;  %v288_v33 = vld [vmem:[%s2243_s8] sm:$0xff]  ;;  %v290_v36 = vld [vmem:[%s2243_s8 + $0x10] sm:$0xff]  ;;  %s1379_s17 = sshll.u32 %s2647_s15, 4  ;;  %s1567_s23 = sshll.u32 %s2123_s22, 10  ;;  %s2662_s17 = int_to_ptr.vmem [resolvable:$true] %s1379_s17 }
  0x75   : > { %520 = vmatprep.subr.bf16.mxu0 %v1752_v13  ;;  %593 = vmatprep.subr.bf16.mxu1 %v1754_v14  ;;  %v289_v34 = vld [vmem:[%s2243_s8 + $0x8] sm:$0xff]  ;;  %v291_v37 = vld [vmem:[%s2243_s8 + $0x18] sm:$0xff]  ;;  %v292_v39 = vld [vmem:[%s2243_s8 + $0x20] sm:$0xff]  ;;  %v334_v13 = vlaneseq  ;;  %s2669_s13 = scalar_lea.hbm %s2718_s5, %s1567_s23  ;;  %s1366_s14 = scalar_lea.sflag [#allocation4], %s2237_s7 }
  0x76   : > { %v296_v35 = vpack.c.bf16 %v289_v34, %v288_v33  ;;  %v297_v38 = vpack.c.bf16 %v291_v37, %v290_v36  ;;  %v293_v40 = vld [vmem:[%s2243_s8 + $0x28] sm:$0xff]  ;;  %v294_v42 = vld [vmem:[%s2243_s8 + $0x30] sm:$0xff]  ;;  %v295_v43 = vld [vmem:[%s2243_s8 + $0x38] sm:$0xff]  ;;  %s1984_s16 = scalar_lea.vmem %s2662_s17, 1024  ;;  %p2766_p6 = scmp.ne.s32.totalorder %s2736_s11, 0 }
  0x77   : > { %v298_v41 = vpack.c.bf16 %v293_v40, %v292_v39  ;;  %v299_v44 = vpack.c.bf16 %v295_v43, %v294_v42  ;;  %v1782_v45 = vld [vmem:[#allocation8 + $0x78] sm:$0xff]   ;;  %v1786_v49 = vld [vmem:[#allocation8 + $0x70] sm:$0xff]   ;;  %v1790_v53 = vld [vmem:[#allocation8 + $0x68] sm:$0xff]   ;;  %v335_v14 = vshrl.u32 %v334_v13, 7  ;;  %p1985_p4 = scmp.ne.s32.totalorder %s2662_s17, %s1984_s16  ;;  %s2069_s22 = smov [#allocation10]  }
  0x78   : > { %521 = vmatpush1.bf16.msra.mxu0 %v1756_v15  ;;  %594 = vmatpush1.bf16.msra.mxu1 %v1757_v16  ;;  %v1784_v46 = vld [vmem:[#allocation8 + $0xf8] sm:$0xff]   ;;  %v1788_v50 = vld [vmem:[#allocation8 + $0xf0] sm:$0xff]   ;;  %v1792_v54 = vld [vmem:[#allocation8 + $0xe8] sm:$0xff]   ;;  %s1988_s28 = sshll.u32 %s2069_s22, 4  ;;  %s1989_s28 = int_to_ptr.vmem [resolvable:$false] %s1988_s28 }
  0x79   : > { %522 = vmatprep.subr.bf16.mxu0 %v1758_v17  ;;  %595 = vmatprep.subr.bf16.mxu1 %v1760_v18  ;;  %v1783_v47 = vld [vmem:[#allocation8 + $0x38] sm:$0xff]   ;;  %v1787_v51 = vld [vmem:[#allocation8 + $0x30] sm:$0xff]   ;;  %v1791_v55 = vld [vmem:[#allocation8 + $0x28] sm:$0xff]   ;;  %v336_v15 = vsub.s32 0, %v335_v14  ;;  %v344_v16 = vsub.s32 2, %v335_v14  ;;  %v340_v18 = vsub.s32 1, %v335_v14  ;;  %p1986_p12 = pnand %p1985_p4, %p2766_p6  ;;  %p1991_p5 = scmp.lt.s32.totalorder %s2662_s17, %s1989_s28 }
  0x7a   : > { %v1785_v48 = vld [vmem:[#allocation8 + $0xb8] sm:$0xff]   ;;  %v1789_v52 = vld [vmem:[#allocation8 + $0xb0] sm:$0xff]   ;;  %v1793_v56 = vld [vmem:[#allocation8 + $0xa8] sm:$0xff]   ;;  %s1990_s30 = scalar_lea.vmem %s1989_s28, 2048 }
  0x7b   : > { %v1794_v57 = vld [vmem:[#allocation8 + $0x60] sm:$0xff]   ;;  %v1798_v61 = vld [vmem:[#allocation8 + $0x58] sm:$0xff]   ;;  %v1802_v1 = vld [vmem:[#allocation8 + $0x50] sm:$0xff]   ;;  %p1987_p0 = pneg %p1986_p12  ;;  %p1992_p3 = scmp.lt.s32.totalorder %s1990_s30, %s1984_s16 }
  0x7c   : > { %523 = vmatpush1.bf16.msra.mxu0 %v1762_v19  ;;  %596 = vmatpush1.bf16.msra.mxu1 %v1763_v20  ;;  %v1796_v58 = vld [vmem:[#allocation8 + $0xe0] sm:$0xff]   ;;  %v1800_v62 = vld [vmem:[#allocation8 + $0xd8] sm:$0xff]   ;;  %v1804_v2 = vld [vmem:[#allocation8 + $0xd0] sm:$0xff]   ;;  %v348_v19 = vsub.s32 3, %v335_v14 }
  0x7d   : > { %524 = vmatprep.subr.bf16.mxu0 %v1764_v21  ;;  %597 = vmatprep.subr.bf16.mxu1 %v1766_v22  ;;  %v1795_v59 = vld [vmem:[#allocation8 + $0x20] sm:$0xff]   ;;  %v1799_v63 = vld [vmem:[#allocation8 + $0x18] sm:$0xff]   ;;  %v1803_v3 = vld [vmem:[#allocation8 + $0x10] sm:$0xff]   ;;  %p1993_p7 = por %p1992_p3, %p1991_p5 }
  0x7e   : > { %v1797_v60 = vld [vmem:[#allocation8 + $0xa0] sm:$0xff]   ;;  %v1805_v4 = vld [vmem:[#allocation8 + $0x90] sm:$0xff]   ;;  %v1806_v5 = vld [vmem:[#allocation8 + $0x48] sm:$0xff]  }
  0x7f   : > { %v1808_v6 = vld [vmem:[#allocation8 + $0xc8] sm:$0xff]   ;;  %v1810_v9 = vld [vmem:[#allocation8 + $0x40] sm:$0xff]   ;;  %v332_v17 = vld [vmem:[#allocation7] sm:$0xf]  ;;  %p1994_p9 = pnand %p1993_p7, %p1987_p0 }
  0x80   : > { %525 = vmatpush1.bf16.msra.mxu0 %v1768_v23  ;;  %598 = vmatpush1.bf16.msra.mxu1 %v1769_v24  ;;  %v1807_v7 = vld [vmem:[#allocation8 + $0x8] sm:$0xff]   ;;  %v1812_v10 = vld [vmem:[#allocation8 + $0xc0] sm:$0xff]   ;;  %v2273_v20 = vrot.slane %v332_v17, %v336_v15  ;;  %v2275_v21 = vrot.slane %v332_v17, %v344_v16  ;;  %v2277_v24 = vrot.slane %v332_v17, %v340_v18 }
  0x81   : > { %526 = vmatprep.subr.bf16.mxu0 %v1770_v25  ;;  %599 = vmatprep.subr.bf16.mxu1 %v1772_v26  ;;  %v1809_v8 = vld [vmem:[#allocation8 + $0x88] sm:$0xff]   ;;  %v1811_v11 = vld [vmem:[#allocation8] sm:$0xff]   ;;  %v2279_v25 = vrot.slane %v332_v17, %v348_v19 }
  0x82   : > { %v1813_v12 = vld [vmem:[#allocation8 + $0x80] sm:$0xff]  }
  0x84   : > { %527 = vmatpush1.bf16.msra.mxu0 %v1774_v27  ;;  %600 = vmatpush1.bf16.msra.mxu1 %v1775_v28 }
  0x85   : > { %528 = vmatprep.subr.bf16.mxu0 %v1776_v29  ;;  %601 = vmatprep.subr.bf16.mxu1 %v1778_v30 }
  0x88   : > { %529 = vmatpush1.bf16.msra.mxu0 %v1780_v31  ;;  %602 = vmatpush1.bf16.msra.mxu1 %v1781_v32 }
  0x89   : > { %1568 = vmatprep.subr.bf16.mxu0 %v1782_v45  ;;  %1608 = vmatprep.subr.bf16.mxu1 %v1784_v46 }
  0x8b   : > { %547 = vmatmul.mubr.bf16.vlgmr.msra.gmra.mxu0 %v296_v35  ;;  %620 = vmatmul.mubr.bf16.vlgmr.msra.gmra.mxu1 %v296_v35 }
  0x8c   : > { %556 = vmatprep.mubr.bf16.mxu0 %v2068_v0  ;;  %629 = vmatprep.mubr.bf16.mxu1 %v2068_v0 }
  0x8d   : > { %1569 = vmatpush3.bf16.msra.mxu0 %v1783_v47  ;;  %1609 = vmatpush3.bf16.msra.mxu1 %v1785_v48 }
  0x8e   : > { %1570 = vmatprep.subr.bf16.mxu0 %v1786_v49  ;;  %1610 = vmatprep.subr.bf16.mxu1 %v1788_v50 }
  0x91   : > { %1571 = vmatpush3.bf16.msra.mxu0 %v1787_v51  ;;  %1611 = vmatpush3.bf16.msra.mxu1 %v1789_v52 }
  0x92   : > { %1572 = vmatprep.subr.bf16.mxu0 %v1790_v53  ;;  %1612 = vmatprep.subr.bf16.mxu1 %v1792_v54 }
  0x93   : > { %557 = vmatmul.mubr.bf16.gmra.mxu0 %v297_v38  ;;  %630 = vmatmul.mubr.bf16.gmra.mxu1 %v297_v38 }
  0x94   : > { %566 = vmatprep.mubr.bf16.mxu0 %v2068_v0  ;;  %639 = vmatprep.mubr.bf16.mxu1 %v2068_v0 }
  0x95   : > { %1573 = vmatpush3.bf16.msra.mxu0 %v1791_v55  ;;  %1613 = vmatpush3.bf16.msra.mxu1 %v1793_v56 }
  0x96   : > { %1574 = vmatprep.subr.bf16.mxu0 %v1794_v57  ;;  %1614 = vmatprep.subr.bf16.mxu1 %v1796_v58 }
  0x99   : > { %1575 = vmatpush3.bf16.msra.mxu0 %v1795_v59  ;;  %1615 = vmatpush3.bf16.msra.mxu1 %v1797_v60 }
  0x9a   : > { %1576 = vmatprep.subr.bf16.mxu0 %v1798_v61  ;;  %1616 = vmatprep.subr.bf16.mxu1 %v1800_v62 }
  0x9b   : > { %567 = vmatmul.mubr.bf16.gmra.mxu0 %v298_v41  ;;  %640 = vmatmul.mubr.bf16.gmra.mxu1 %v298_v41 }
  0x9c   : > { %576 = vmatprep.mubr.bf16.mxu0 %v2068_v0  ;;  %649 = vmatprep.mubr.bf16.mxu1 %v2068_v0  ;;  %v1801_v0 = vld [vmem:[#allocation8 + $0x98] sm:$0xff]  }
  0x9d   : > { %1577 = vmatpush3.bf16.msra.mxu0 %v1799_v63  ;;  %1617 = vmatpush3.bf16.msra.mxu1 %v1801_v0 }
  0x9e   : > { %1578 = vmatprep.subr.bf16.mxu0 %v1802_v1  ;;  %1618 = vmatprep.subr.bf16.mxu1 %v1804_v2 }
  0xa1   : > { %1579 = vmatpush3.bf16.msra.mxu0 %v1803_v3  ;;  %1619 = vmatpush3.bf16.msra.mxu1 %v1805_v4 }
  0xa2   : > { %1580 = vmatprep.subr.bf16.mxu0 %v1806_v5  ;;  %1620 = vmatprep.subr.bf16.mxu1 %v1808_v6 }
  0xa3   : > { %577 = vmatmul.mubr.bf16.gmra.mxu0 %v299_v44  ;;  %650 = vmatmul.mubr.bf16.gmra.mxu1 %v299_v44 }
  0xa5   : > { %1581 = vmatpush3.bf16.msra.mxu0 %v1807_v7  ;;  %1621 = vmatpush3.bf16.msra.mxu1 %v1809_v8 }
  0xa6   : > { %1582 = vmatprep.subr.bf16.mxu0 %v1810_v9  ;;  %1622 = vmatprep.subr.bf16.mxu1 %v1812_v10 }
  0xa9   : > { %1583 = vmatpush3.bf16.msra.mxu0 %v1811_v11  ;;  %1623 = vmatpush3.bf16.msra.mxu1 %v1813_v12 }
 0x14b   : > { %v548_v22 = vpop.f32.mrf.mxu0  ;;  %v621_v23 = vpop.f32.mrf.mxu1 }
 0x14c   : > { %v549_v26 = vadd.f32 %v548_v22, %v2273_v20  ;;  %v622_v27 = vadd.f32 %v621_v23, %v2275_v21 }
 0x14d   : > { %v550_v28 = vpop.f32.mrf.mxu0  ;;  %v623_v29 = vpop.f32.mrf.mxu1 }
 0x14e   : > { %v692_v30 = vmul.f32 0.044715, %v549_v26  ;;  %v694_v31 = vmul.f32 0.044715, %v622_v27  ;;  %v2284_v32 = vadd.f32 %v550_v28, %v2277_v24  ;;  %v2287_v33 = vadd.f32 %v623_v29, %v2279_v25 }
 0x14f   : > { %v552_v34 = vpop.f32.mrf.mxu0  ;;  %v625_v35 = vpop.f32.mrf.mxu1  ;;  %v2296_v53 = vmul.f32 0.5, %v549_v26  ;;  %v2301_v58 = vmul.f32 0.5, %v622_v27 }
 0x150   : > { %v724_v36 = vmul.f32 %v692_v30, %v549_v26  ;;  %v726_v37 = vmul.f32 %v694_v31, %v622_v27  ;;  %v553_v38 = vadd.f32 %v552_v34, %v2273_v20  ;;  %v626_v39 = vadd.f32 %v625_v35, %v2275_v21 }
 0x151   : > { %v554_v40 = vpop.f32.mrf.mxu0  ;;  %v627_v41 = vpop.f32.mrf.mxu1  ;;  %v693_v45 = vmul.f32 0.044715, %v2284_v32  ;;  %v695_v50 = vmul.f32 0.044715, %v2287_v33  ;;  %v2304_v61 = vmul.f32 0.5, %v2284_v32  ;;  %v2322_v13 = vmul.f32 0.5, %v2287_v33 }
 0x152   : > { %v756_v42 = vmul.f32 %v724_v36, %v549_v26  ;;  %v758_v43 = vmul.f32 %v726_v37, %v622_v27  ;;  %v696_v44 = vmul.f32 0.044715, %v553_v38  ;;  %v698_v46 = vmul.f32 0.044715, %v626_v39 }
 0x153   : > { %v558_v47 = vpop.f32.mrf.mxu0  ;;  %v631_v48 = vpop.f32.mrf.mxu1  ;;  %v2294_v52 = vadd.f32 %v554_v40, %v2277_v24  ;;  %v2299_v55 = vadd.f32 %v627_v41, %v2279_v25  ;;  %2744 = vst [vmem:[#allocation15_spill] sm:$0xff] %v2304_v61  ;;  %v725_v62 = vmul.f32 %v693_v45, %v2284_v32  ;;  %v727_v5 = vmul.f32 %v695_v50, %v2287_v33 }
 0x154   : > { %v788_v49 = vadd.f32 %v756_v42, %v549_v26  ;;  %v728_v51 = vmul.f32 %v696_v44, %v553_v38  ;;  %v730_v54 = vmul.f32 %v698_v46, %v626_v39  ;;  %v790_v59 = vadd.f32 %v758_v43, %v622_v27  ;;  %2745 = vst [vmem:[#allocation16_spill] sm:$0xff] %v2322_v13 }
 0x155   : > { %v560_v56 = vpop.f32.mrf.mxu0  ;;  %v633_v57 = vpop.f32.mrf.mxu1  ;;  %v2308_v0 = vadd.f32 %v558_v47, %v2273_v20  ;;  %v2311_v1 = vadd.f32 %v631_v48, %v2275_v21  ;;  %v697_v6 = vmul.f32 0.044715, %v2294_v52  ;;  %v2318_v8 = vmul.f32 0.5, %v553_v38 }
 0x156   : > { %v760_v60 = vmul.f32 %v728_v51, %v553_v38  ;;  %v762_v63 = vmul.f32 %v730_v54, %v626_v39  ;;  %v820_v4 = vmul.f32 0.7978846, %v788_v49  ;;  %v2316_v7 = vadd.f32 %v560_v56, %v2277_v24 }
 0x157   : > { %v562_v2 = vpop.f32.mrf.mxu0  ;;  %v635_v3 = vpop.f32.mrf.mxu1  ;;  %v699_v10 = vmul.f32 0.044715, %v2299_v55  ;;  %v822_v14 = vmul.f32 0.7978846, %v790_v59  ;;  %v2324_v15 = vmul.f32 0.5, %v626_v39  ;;  %v2328_v18 = vmul.f32 %v725_v62, %v2284_v32 }
 0x158   : > { %v792_v9 = vadd.f32 %v760_v60, %v553_v38  ;;  %v794_v16 = vadd.f32 %v762_v63, %v626_v39  ;;  %v700_v17 = vmul.f32 0.044715, %v2308_v0  ;;  %v702_v19 = vmul.f32 0.044715, %v2311_v1 }
 0x159   : > { %v564_v11 = vpop.f32.mrf.mxu0  ;;  %v637_v12 = vpop.f32.mrf.mxu1  ;;  %2746 = vst [vmem:[#allocation17_spill] sm:$0xff] %v2324_v15  ;;  %v701_v22 = vmul.f32 0.044715, %v2316_v7  ;;  %v2333_v23 = vadd.f32 %v633_v57, %v2279_v25  ;;  %1814 = vtanh.f32 %v820_v4  ;;  %v2336_v28 = vmul.f32 %v727_v5, %v2287_v33 }
 0x15a   : > { %v729_v29 = vmul.f32 %v697_v6, %v2294_v52  ;;  %v2340_v30 = vadd.f32 %v562_v2, %v2273_v20  ;;  %v824_v31 = vmul.f32 0.7978846, %v792_v9  ;;  %v731_v34 = vmul.f32 %v699_v10, %v2299_v55 }
 0x15b   : > { %v568_v26 = vpop.f32.mrf.mxu0  ;;  %v641_v27 = vpop.f32.mrf.mxu1  ;;  %v703_v35 = vmul.f32 0.044715, %v2333_v23  ;;  %v2345_v36 = vadd.f32 %v635_v3, %v2275_v21  ;;  %1816 = vtanh.f32 %v822_v14  ;;  %v826_v39 = vmul.f32 0.7978846, %v794_v16 }
 0x15c   : > { %v732_v40 = vmul.f32 %v700_v17, %v2308_v0  ;;  %v2349_v41 = vadd.f32 %v564_v11, %v2277_v24  ;;  %v734_v42 = vmul.f32 %v702_v19, %v2311_v1  ;;  %v733_v43 = vmul.f32 %v701_v22, %v2316_v7 }
 0x15d   : > { %v570_v37 = vpop.f32.mrf.mxu0  ;;  %v643_v38 = vpop.f32.mrf.mxu1  ;;  %v2354_v44 = vadd.f32 %v637_v12, %v2279_v25  ;;  %v2357_v45 = vadd.f32 %v568_v26, %v2273_v20  ;;  %v2360_v48 = vmul.f32 %v729_v29, %v2294_v52  ;;  %v704_v49 = vmul.f32 0.044715, %v2340_v30 }
 0x15e   : > { %v2364_v50 = vadd.f32 %v641_v27, %v2275_v21  ;;  %v2367_v51 = vadd.f32 %v570_v37, %v2277_v24  ;;  %1818 = vtanh.f32 %v824_v31  ;;  %v2370_v54 = vmul.f32 %v731_v34, %v2299_v55 }
 0x15f   : > { %2747 = vst [vmem:[#allocation18_spill] sm:$0xff] %v2357_v45  ;;  %v572_v46 = vpop.f32.mrf.mxu0  ;;  %v645_v47 = vpop.f32.mrf.mxu1  ;;  %v735_v56 = vmul.f32 %v703_v35, %v2333_v23  ;;  %v706_v57 = vmul.f32 0.044715, %v2345_v36  ;;  %1820 = vtanh.f32 %v826_v39  ;;  %v2375_v62 = vmul.f32 %v732_v40, %v2308_v0 }
 0x160   : > { %2748 = vst [vmem:[#allocation19_spill] sm:$0xff] %v2364_v50  ;;  %v705_v63 = vmul.f32 0.044715, %v2349_v41  ;;  %v707_v2 = vmul.f32 0.044715, %v2354_v44  ;;  %v2380_v3 = vmul.f32 %v734_v42, %v2311_v1  ;;  %v2383_v4 = vmul.f32 %v733_v43, %v2316_v7 }
 0x161   : > { %v574_v59 = vpop.f32.mrf.mxu0  ;;  %v647_v60 = vpop.f32.mrf.mxu1  ;;  %v708_v5 = vmul.f32 0.044715, %v2357_v45  ;;  %v2387_v6 = vadd.f32 %v643_v38, %v2279_v25  ;;  %v736_v11 = vmul.f32 %v704_v49, %v2340_v30  ;;  %v710_v12 = vmul.f32 0.044715, %v2364_v50 }
 0x162   : > { %v709_v14 = vmul.f32 0.044715, %v2367_v51  ;;  %v2393_v16 = vadd.f32 %v572_v46, %v2273_v20  ;;  %v2396_v17 = vmul.f32 %v735_v56, %v2333_v23  ;;  %v738_v19 = vmul.f32 %v706_v57, %v2345_v36 }
 0x163   : > { %v578_v9 = vpop.f32.mrf.mxu0  ;;  %v651_v10 = vpop.f32.mrf.mxu1  ;;  %v711_v22 = vmul.f32 0.044715, %v2387_v6  ;;  %v2401_v26 = vadd.f32 %v645_v47, %v2275_v21  ;;  %v737_v31 = vmul.f32 %v705_v63, %v2349_v41  ;;  %v739_v34 = vmul.f32 %v707_v2, %v2354_v44 }
 0x164   : > { %2749 = vst [vmem:[#allocation20_spill] sm:$0xff] %v2393_v16  ;;  %v712_v35 = vmul.f32 0.044715, %v2393_v16  ;;  %v2407_v37 = vadd.f32 %v574_v59, %v2277_v24  ;;  %v740_v38 = vmul.f32 %v708_v5, %v2357_v45  ;;  %v2412_v40 = vadd.f32 %v647_v60, %v2279_v25 }
 0x165   : > { %2750 = vst [vmem:[#allocation21_spill] sm:$0xff] %v2401_v26  ;;  %v580_v27 = vpop.f32.mrf.mxu0  ;;  %v653_v29 = vpop.f32.mrf.mxu1  ;;  %v714_v39 = vmul.f32 0.044715, %v2401_v26  ;;  %v2415_v42 = vadd.f32 %v578_v9, %v2273_v20  ;;  %v2418_v46 = vmul.f32 %v736_v11, %v2340_v30  ;;  %v742_v47 = vmul.f32 %v710_v12, %v2364_v50 }
 0x166   : > { %v741_v49 = vmul.f32 %v709_v14, %v2367_v51  ;;  %v743_v56 = vmul.f32 %v711_v22, %v2387_v6  ;;  %v1815_v59 = vpop.eup %1814  ;;  %v2424_v63 = vmul.f32 %v738_v19, %v2345_v36  ;;  %v713_v60 = vmul.f32 0.044715, %v2407_v37 }
 0x167   : > { %v582_v43 = vpop.f32.mrf.mxu0  ;;  %v655_v57 = vpop.f32.mrf.mxu1  ;;  %v2428_v2 = vadd.f32 %v651_v10, %v2275_v21  ;;  %v2431_v5 = vadd.f32 %v580_v27, %v2277_v24  ;;  %v2434_v9 = vmul.f32 %v737_v31, %v2349_v41  ;;  %v744_v11 = vmul.f32 %v712_v35, %v2393_v16 }
 0x168   : > { %v715_v12 = vmul.f32 0.044715, %v2412_v40  ;;  %v716_v14 = vmul.f32 0.044715, %v2415_v42  ;;  %v2439_v22 = vpop.eup %1816  ;;  %v2442_v19 = vmul.f32 %v739_v34, %v2354_v44  ;;  %v2445_v10 = vmul.f32 %v740_v38, %v2357_v45 }
 0x169   : > { %v746_v27 = vmul.f32 %v714_v39, %v2401_v26  ;;  %v2449_v13 = vadd.f32 %v653_v29, %v2279_v25  ;;  %v584_v31 = vpop.f32.mrf.mxu0  ;;  %v2452_v35 = vmul.f32 %v742_v47, %v2364_v50  ;;  %v2455_v61 = vmul.f32 %v741_v49, %v2367_v51  ;;  %v657_v38 = vpop.f32.mrf.mxu1 }
 0x16a   : > { %2751 = vst [vmem:[#allocation22_spill] sm:$0xff] %v2445_v10  ;;  %v2458_v15 = vmul.f32 %v743_v56, %v2387_v6  ;;  %v2461_v34 = vadd.f32 %v582_v43, %v2273_v20  ;;  %v745_v10 = vmul.f32 %v713_v60, %v2407_v37  ;;  %v718_v39 = vmul.f32 0.044715, %v2428_v2 }
 0x16b   : > { %2752 = vst [vmem:[#allocation23_spill] sm:$0xff] %v2452_v35  ;;  %v717_v29 = vmul.f32 0.044715, %v2431_v5  ;;  %v2467_v45 = vadd.f32 %v655_v57, %v2275_v21  ;;  %v1819_v47 = vpop.eup %1818  ;;  %v2470_v49 = vmul.f32 %v744_v11, %v2393_v16  ;;  %v747_v56 = vmul.f32 %v715_v12, %v2412_v40 }
 0x16c   : > { %v748_v35 = vmul.f32 %v716_v14, %v2415_v42  ;;  %v2475_v20 = vadd.f32 %v584_v31, %v2277_v24  ;;  %v1821_v43 = vpop.eup %1820  ;;  %v2478_v60 = vmul.f32 %v746_v27, %v2401_v26  ;;  %v719_v50 = vmul.f32 0.044715, %v2449_v13 }
 0x16d   : > { %2753 = vst [vmem:[#allocation24_spill] sm:$0xff] %v2470_v49  ;;  %v720_v21 = vmul.f32 0.044715, %v2461_v34  ;;  %v2483_v57 = vadd.f32 %v657_v38, %v2279_v25  ;;  %v722_v11 = vmul.f32 0.044715, %v2467_v45  ;;  %v789_v14 = vadd.f32 %v2328_v18, %v2284_v32 }
 0x16e   : > { %2754 = vst [vmem:[#allocation25_spill] sm:$0xff] %v2478_v60  ;;  %v721_v12 = vmul.f32 0.044715, %v2475_v20  ;;  %v793_v24 = vadd.f32 %v2360_v48, %v2294_v52  ;;  %v2492_v27 = vmul.f32 %v745_v10, %v2407_v37  ;;  %v750_v31 = vmul.f32 %v718_v39, %v2428_v2 }
 0x16f   : > { %v749_v60 = vmul.f32 %v717_v29, %v2431_v5  ;;  %v723_v25 = vmul.f32 0.044715, %v2483_v57  ;;  %v2498_v38 = vmul.f32 %v747_v56, %v2412_v40  ;;  %v2501_v26 = vmul.f32 %v748_v35, %v2415_v42 }
 0x170   : > { %v821_v49 = vmul.f32 0.7978846, %v789_v14  ;;  %v825_v32 = vmul.f32 0.7978846, %v793_v24  ;;  %v751_v18 = vmul.f32 %v719_v50, %v2449_v13  ;;  %v752_v48 = vmul.f32 %v720_v21, %v2461_v34 }
 0x171   : > { %v791_v10 = vadd.f32 %v2336_v28, %v2287_v33  ;;  %v795_v39 = vadd.f32 %v2370_v54, %v2299_v55  ;;  %v754_v29 = vmul.f32 %v722_v11, %v2467_v45  ;;  %v753_v56 = vmul.f32 %v721_v12, %v2475_v20 }
 0x172   : > { %v755_v16 = vmul.f32 %v723_v25, %v2483_v57  ;;  %1822 = vtanh.f32 %v821_v49  ;;  %v884_v24 = vadd.f32 1.0, %v1815_v59  ;;  %v2513_v50 = vmul.f32 %v750_v31, %v2428_v2 }
 0x173   : > { %1824 = vtanh.f32 %v825_v32  ;;  %v823_v35 = vmul.f32 0.7978846, %v791_v10  ;;  %v827_v14 = vmul.f32 0.7978846, %v795_v39  ;;  %v2516_v21 = vmul.f32 %v749_v60, %v2431_v5 }
 0x174   : > { %v665_v33 = vmul.f32 0.5, %v2294_v52  ;;  %v888_v28 = vadd.f32 1.0, %v1819_v47  ;;  %v2520_v54 = vmul.f32 %v751_v18, %v2449_v13  ;;  %v2523_v11 = vmul.f32 0.5, %v2299_v55 }
 0x175   : > { %1826 = vtanh.f32 %v823_v35  ;;  %v797_v49 = vadd.f32 %v2383_v4, %v2316_v7  ;;  %v2528_v59 = vmul.f32 %v752_v48, %v2461_v34  ;;  %v2531_v12 = vmul.f32 %v754_v29, %v2467_v45 }
 0x176   : > { %v2534_v60 = vmul.f32 %v753_v56, %v2475_v20  ;;  %1828 = vtanh.f32 %v827_v14  ;;  %v2537_v52 = vmul.f32 %v755_v16, %v2483_v57  ;;  %v2540_v55 = vmul.f32 %v884_v24, %v2296_v53  ;;  %v2755_v56 = vld [vmem:[#allocation17_spill] sm:$0xff] }
 0x177   : > { %v801_v47 = vadd.f32 %v2434_v9, %v2349_v41  ;;  %v829_v4 = vmul.f32 0.7978846, %v797_v49  ;;  %v2545_v31 = vmul.f32 %v888_v28, %v2318_v8  ;;  %v886_v25 = vadd.f32 1.0, %v2439_v22 }
 0x178   : > { %v799_v32 = vadd.f32 %v2396_v17, %v2333_v23  ;;  %v803_v18 = vadd.f32 %v2442_v19, %v2354_v44  ;;  %v890_v16 = vadd.f32 1.0, %v1821_v43  ;;  %v796_v53 = vadd.f32 %v2375_v62, %v2308_v0 }
 0x179   : > { %v833_v48 = vmul.f32 0.7978846, %v801_v47  ;;  %1830 = vtanh.f32 %v829_v4  ;;  %v2555_v9 = vmul.f32 0.5, %v2316_v7  ;;  %v800_v22 = vadd.f32 %v2418_v46, %v2340_v30 }
 0x17a   : > { %v831_v10 = vmul.f32 0.7978846, %v799_v32  ;;  %v835_v8 = vmul.f32 0.7978846, %v803_v18  ;;  %v2560_v39 = vmul.f32 0.5, %v2349_v41  ;;  %v798_v19 = vadd.f32 %v2380_v3, %v2311_v1 }
 0x17b   : > { %1832 = vtanh.f32 %v833_v48  ;;  %v828_v17 = vmul.f32 0.7978846, %v796_v53  ;;  %v948_v43 = vpack.c.bf16 %v2545_v31, %v2540_v55  ;;  %v832_v62 = vmul.f32 0.7978846, %v800_v22 }
 0x17c   : > { %1834 = vtanh.f32 %v831_v10  ;;  %v802_v7 = vadd.f32 %v2424_v63, %v2345_v36  ;;  %v2569_v29 = vmul.f32 %v886_v25, %v2301_v58  ;;  %v830_v46 = vmul.f32 0.7978846, %v798_v19  ;;  %v2757_v10 = vld [vmem:[#allocation18_spill] sm:$0xff]  ;;  %v2760_v19 = vld [vmem:[#allocation24_spill] sm:$0xff] }
 0x17d   : > { %1836 = vtanh.f32 %v835_v8  ;;  %v805_v41 = vadd.f32 %v2455_v61, %v2367_v51  ;;  %v2574_v35 = vmul.f32 %v890_v16, %v2755_v56  ;;  %v809_v14 = vadd.f32 %v2492_v27, %v2407_v37  ;;  %v2758_v8 = vld [vmem:[#allocation22_spill] sm:$0xff]  ;;  %v2761_v56 = vld [vmem:[#allocation16_spill] sm:$0xff] }
 0x17e   : > { %1838 = vtanh.f32 %v828_v17  ;;  %v834_v3 = vmul.f32 0.7978846, %v802_v7  ;;  %v2579_v28 = vmul.f32 0.5, %v2333_v23  ;;  %v807_v63 = vadd.f32 %v2458_v15, %v2387_v6  ;;  %v2756_v23 = vld [vmem:[#allocation15_spill] sm:$0xff]  ;;  %v2759_v17 = vld [vmem:[#allocation20_spill] sm:$0xff] }
 0x17f   : > { %v1823_v24 = vpop.eup %1822  ;;  %1840 = vtanh.f32 %v832_v62  ;;  %v837_v58 = vmul.f32 0.7978846, %v805_v41  ;;  %v841_v61 = vmul.f32 0.7978846, %v809_v14  ;;  %v811_v47 = vadd.f32 %v2498_v38, %v2412_v40  ;;  %v2762_v14 = vld [vmem:[#allocation19_spill] sm:$0xff] }
 0x180   : > { %v1825_v49 = vpop.eup %1824  ;;  %v885_v55 = vadd.f32 1.0, %v1823_v24  ;;  %1842 = vtanh.f32 %v830_v46  ;;  %v675_v31 = vmul.f32 0.5, %v2354_v44  ;;  %v839_v27 = vmul.f32 0.7978846, %v807_v63  ;;  %v2763_v24 = vld [vmem:[#allocation23_spill] sm:$0xff] }
 0x181   : > { %v889_v4 = vadd.f32 1.0, %v1825_v49  ;;  %1844 = vtanh.f32 %v834_v3  ;;  %v950_v18 = vpack.c.bf16 %v2574_v35, %v2569_v29  ;;  %v843_v15 = vmul.f32 0.7978846, %v811_v47  ;;  %v2764_v49 = vld [vmem:[#allocation21_spill] sm:$0xff] }
 0x182   : > { %v1827_v25 = vpop.eup %1826  ;;  %v917_v32 = vmul.f32 %v885_v55, %v2756_v23  ;;  %1846 = vtanh.f32 %v837_v58  ;;  %v804_v38 = vadd.f32 %v2758_v8, %v2757_v10  ;;  %v668_v44 = vmul.f32 0.5, %v2308_v0  ;;  %v2765_v55 = vld [vmem:[#allocation25_spill] sm:$0xff] }
 0x183   : > { %v1829_v16 = vpop.eup %1828  ;;  %v921_v48 = vmul.f32 %v889_v4, %v665_v33  ;;  %v887_v53 = vadd.f32 1.0, %v1827_v25  ;;  %1848 = vtanh.f32 %v841_v61  ;;  %v808_v62 = vadd.f32 %v2760_v19, %v2759_v17 }
 0x184   : > { %v891_v22 = vadd.f32 1.0, %v1829_v16  ;;  %1850 = vtanh.f32 %v839_v27  ;;  %v672_v46 = vmul.f32 0.5, %v2340_v30  ;;  %v836_v29 = vmul.f32 0.7978846, %v804_v38 }
 0x185   : > { %v949_v7 = vpack.c.bf16 %v921_v48, %v917_v32  ;;  %1852 = vtanh.f32 %v843_v15  ;;  %v919_v33 = vmul.f32 %v887_v53, %v2761_v56  ;;  %v840_v3 = vmul.f32 0.7978846, %v808_v62 }
 0x186   : > { %v1831_v41 = vpop.eup %1830  ;;  %v923_v35 = vmul.f32 %v891_v22, %v2523_v11  ;;  %v806_v58 = vadd.f32 %v2763_v24, %v2762_v14  ;;  %v670_v63 = vmul.f32 0.5, %v2311_v1  ;;  %1854 = vtanh.f32 %v836_v29 }
 0x187   : > { %1259 = vmatprep.mubr.bf16.mxu0 %v949_v7  ;;  %v893_v0 = vadd.f32 1.0, %v1831_v41  ;;  %v810_v61 = vadd.f32 %v2765_v55, %v2764_v49  ;;  %v674_v4 = vmul.f32 0.5, %v2345_v36  ;;  %1856 = vtanh.f32 %v840_v3 }
 0x188   : > { %v1833_v30 = vpop.eup %1832  ;;  %v951_v47 = vpack.c.bf16 %v923_v35, %v919_v33  ;;  %1260 = vmatmul.mubr.bf16.vlgmr.msra.gmra.mxu0 %v948_v43  ;;  %v838_v27 = vmul.f32 0.7978846, %v806_v58  ;;  %v677_v23 = vmul.f32 0.5, %v2367_v51  ;;  %v813_v15 = vadd.f32 %v2516_v21, %v2431_v5 }
 0x189   : > { %v1835_v11 = vpop.eup %1834  ;;  %v897_v25 = vadd.f32 1.0, %v1833_v30  ;;  %v842_v32 = vmul.f32 0.7978846, %v810_v61  ;;  %v925_v16 = vmul.f32 %v893_v0, %v2555_v9  ;;  %v817_v43 = vadd.f32 %v2534_v60, %v2475_v20 }
 0x18a   : > { %v1837_v1 = vpop.eup %1836  ;;  %1324 = vmatprep.mubr.bf16.mxu1 %v951_v47  ;;  %v895_v48 = vadd.f32 1.0, %v1835_v11  ;;  %1858 = vtanh.f32 %v838_v27  ;;  %v845_v51 = vmul.f32 0.7978846, %v813_v15  ;;  %v681_v19 = vmul.f32 0.5, %v2407_v37 }
 0x18b   : > { %v1839_v36 = vpop.eup %1838  ;;  %1325 = vmatmul.mubr.bf16.vlgmr.msra.gmra.mxu1 %v950_v18  ;;  %v929_v53 = vmul.f32 %v897_v25, %v2560_v39  ;;  %v899_v8 = vadd.f32 1.0, %v1837_v1  ;;  %1860 = vtanh.f32 %v842_v32  ;;  %v849_v62 = vmul.f32 0.7978846, %v817_v43 }
 0x18c   : > { %v1841_v38 = vpop.eup %1840  ;;  %v927_v22 = vmul.f32 %v895_v48, %v2579_v28  ;;  %v892_v21 = vadd.f32 1.0, %v1839_v36  ;;  %1862 = vtanh.f32 %v845_v51  ;;  %v815_v39 = vadd.f32 %v2520_v54, %v2449_v13 }
 0x18d   : > { %v1843_v9 = vpop.eup %1842  ;;  %v953_v7 = vpack.c.bf16 %v929_v53, %v925_v16  ;;  %v931_v29 = vmul.f32 %v899_v8, %v675_v31  ;;  %v896_v41 = vadd.f32 1.0, %v1841_v38  ;;  %1864 = vtanh.f32 %v849_v62 }
 0x18e   : > { %v1845_v60 = vpop.eup %1844  ;;  %v924_v56 = vmul.f32 %v892_v21, %v668_v44  ;;  %v894_v18 = vadd.f32 1.0, %v1843_v9  ;;  %v819_v37 = vadd.f32 %v2537_v52, %v2483_v57  ;;  %v679_v0 = vmul.f32 0.5, %v2387_v6 }
 0x18f   : > { %v1847_v33 = vpop.eup %1846  ;;  %1267 = vmatprep.mubr.bf16.mxu0 %v953_v7  ;;  %v955_v35 = vpack.c.bf16 %v931_v29, %v927_v22  ;;  %v928_v28 = vmul.f32 %v896_v41, %v672_v46  ;;  %v898_v3 = vadd.f32 1.0, %v1845_v60  ;;  %v847_v55 = vmul.f32 0.7978846, %v815_v39 }
 0x190   : > { %v1849_v24 = vpop.eup %1848  ;;  %v926_v58 = vmul.f32 %v894_v18, %v670_v63  ;;  %v901_v31 = vadd.f32 1.0, %v1847_v33  ;;  %v851_v54 = vmul.f32 0.7978846, %v819_v37  ;;  %v683_v46 = vmul.f32 0.5, %v2412_v40 }
 0x191   : > { %v1851_v44 = vpop.eup %1850  ;;  %1332 = vmatprep.mubr.bf16.mxu1 %v955_v35  ;;  %v952_v61 = vpack.c.bf16 %v928_v28, %v924_v56  ;;  %v930_v30 = vmul.f32 %v898_v3, %v674_v4  ;;  %v905_v47 = vadd.f32 1.0, %v1849_v24  ;;  %1866 = vtanh.f32 %v847_v55 }
 0x192   : > { %v1853_v27 = vpop.eup %1852  ;;  %v933_v11 = vmul.f32 %v901_v31, %v677_v23  ;;  %v903_v25 = vadd.f32 1.0, %v1851_v44  ;;  %1868 = vtanh.f32 %v851_v54  ;;  %v676_v6 = vmul.f32 0.5, %v2757_v10 }
 0x193   : > { %1268 = vmatmul.mubr.bf16.gmra.mxu0 %v952_v61  ;;  %v954_v52 = vpack.c.bf16 %v930_v30, %v926_v58  ;;  %v937_v32 = vmul.f32 %v905_v47, %v681_v19  ;;  %v907_v63 = vadd.f32 1.0, %v1853_v27  ;;  %v1855_v15 = vpop.eup %1854  ;;  %v680_v1 = vmul.f32 0.5, %v2759_v17 }
 0x194   : > { %v812_v4 = vadd.f32 %v2501_v26, %v2415_v42  ;;  %v816_v23 = vadd.f32 %v2528_v59, %v2461_v34  ;;  %v1857_v16 = vpop.eup %1856  ;;  %v935_v48 = vmul.f32 %v903_v25, %v679_v0  ;;  %v900_v36 = vadd.f32 1.0, %v1855_v15 }
 0x195   : > { %1333 = vmatmul.mubr.bf16.gmra.mxu1 %v954_v52  ;;  %v957_v40 = vpack.c.bf16 %v937_v32, %v933_v11  ;;  %v939_v43 = vmul.f32 %v907_v63, %v683_v46  ;;  %v904_v53 = vadd.f32 1.0, %v1857_v16  ;;  %v814_v10 = vadd.f32 %v2513_v50, %v2428_v2 }
 0x196   : > { %v844_v8 = vmul.f32 0.7978846, %v812_v4  ;;  %v848_v51 = vmul.f32 0.7978846, %v816_v23  ;;  %v932_v22 = vmul.f32 %v900_v36, %v676_v6  ;;  %v678_v26 = vmul.f32 0.5, %v2762_v14 }
 0x197   : > { %v1859_v38 = vpop.eup %1858  ;;  %1275 = vmatprep.mubr.bf16.mxu0 %v957_v40  ;;  %v959_v17 = vpack.c.bf16 %v939_v43, %v935_v48  ;;  %v818_v59 = vadd.f32 %v2531_v12, %v2467_v45  ;;  %v936_v19 = vmul.f32 %v904_v53, %v680_v1  ;;  %v846_v9 = vmul.f32 0.7978846, %v814_v10 }
 0x198   : > { %v1861_v21 = vpop.eup %1860  ;;  %v902_v62 = vadd.f32 1.0, %v1859_v38  ;;  %1870 = vtanh.f32 %v844_v8  ;;  %v682_v7 = vmul.f32 0.5, %v2764_v49  ;;  %v685_v12 = vmul.f32 0.5, %v2431_v5 }
 0x199   : > { %1340 = vmatprep.mubr.bf16.mxu1 %v959_v17  ;;  %v906_v29 = vadd.f32 1.0, %v1861_v21  ;;  %1872 = vtanh.f32 %v848_v51  ;;  %v850_v50 = vmul.f32 0.7978846, %v818_v59  ;;  %v1863_v41 = vpop.eup %1862  ;;  %v956_v60 = vpack.c.bf16 %v936_v19, %v932_v22 }
 0x19a   : > { %1874 = vtanh.f32 %v846_v9  ;;  %v1865_v56 = vpop.eup %1864  ;;  %v934_v18 = vmul.f32 %v902_v62, %v678_v26  ;;  %v909_v39 = vadd.f32 1.0, %v1863_v41  ;;  %v689_v33 = vmul.f32 0.5, %v2475_v20 }
 0x19b   : > { %v938_v14 = vmul.f32 %v906_v29, %v682_v7  ;;  %1876 = vtanh.f32 %v850_v50  ;;  %1276 = vmatmul.mubr.bf16.gmra.mxu0 %v956_v60  ;;  %v913_v35 = vadd.f32 1.0, %v1865_v56  ;;  %v687_v0 = vmul.f32 0.5, %v2449_v13 }
 0x19c   : > { %v941_v3 = vmul.f32 %v909_v39, %v685_v12  ;;  %v691_v55 = vmul.f32 0.5, %v2483_v57  ;;  %v684_v11 = vmul.f32 0.5, %v2415_v42  ;;  %v688_v46 = vmul.f32 0.5, %v2461_v34  ;;  %v2641_v34 = vld [vmem:[%s2717_s4] ss:$0 sm:$0xff] }
 0x19d   : > { %v958_v28 = vpack.c.bf16 %v938_v14, %v934_v18  ;;  %v945_v49 = vmul.f32 %v913_v35, %v689_v33  ;;  %v686_v13 = vmul.f32 0.5, %v2428_v2  ;;  %v690_v15 = vmul.f32 0.5, %v2467_v45 }
 0x19e   : > { %v1867_v37 = vpop.eup %1866 }
 0x19f   : > { %1341 = vmatmul.mubr.bf16.gmra.mxu1 %v958_v28  ;;  %v1869_v24 = vpop.eup %1868  ;;  %v961_v58 = vpack.c.bf16 %v945_v49, %v941_v3  ;;  %v911_v31 = vadd.f32 1.0, %v1867_v37 }
 0x1a0   : > { %v915_v44 = vadd.f32 1.0, %v1869_v24 }
 0x1a1   : > { %1283 = vmatprep.mubr.bf16.mxu0 %v961_v58  ;;  %v943_v61 = vmul.f32 %v911_v31, %v687_v0 }
 0x1a2   : > { %v947_v30 = vmul.f32 %v915_v44, %v691_v55 }
 0x1a4   : > { %v963_v47 = vpack.c.bf16 %v947_v30, %v943_v61 }
 0x1a5   : > { %v1871_v5 = vpop.eup %1870 }
 0x1a6   : > { %v1873_v20 = vpop.eup %1872  ;;  %v908_v54 = vadd.f32 1.0, %v1871_v5  ;;  %1348 = vmatprep.mubr.bf16.mxu1 %v963_v47 }
 0x1a7   : > { %v1875_v27 = vpop.eup %1874  ;;  %v912_v25 = vadd.f32 1.0, %v1873_v20 }
 0x1a8   : > { %v1877_v52 = vpop.eup %1876  ;;  %v910_v32 = vadd.f32 1.0, %v1875_v27  ;;  %v940_v57 = vmul.f32 %v908_v54, %v684_v11 }
 0x1a9   : > { %v944_v63 = vmul.f32 %v912_v25, %v688_v46  ;;  %v914_v6 = vadd.f32 1.0, %v1877_v52 }
 0x1aa   : > { %v942_v4 = vmul.f32 %v910_v32, %v686_v13 }
 0x1ab   : > { %v960_v1 = vpack.c.bf16 %v944_v63, %v940_v57  ;;  %v946_v23 = vmul.f32 %v914_v6, %v690_v15 }
 0x1ad   : > { %1284 = vmatmul.mubr.bf16.gmra.mxu0 %v960_v1  ;;  %v962_v16 = vpack.c.bf16 %v946_v23, %v942_v4 }
 0x1af   : > { %1349 = vmatmul.mubr.bf16.gmra.mxu1 %v962_v16 }
 0x248   : > { %v1584_v42 = vpop.f32.mrf.mxu0 }
 0x24a   : > { %v1585_v2 = vpop.f32.mrf.mxu0 }
 0x24b   : > { %v1624_v40 = vpop.f32.mrf.mxu1  ;;  %v1586_v48 = vadd.f32 %v1585_v2, %v1584_v42 }
 0x24c   : > { %v1587_v43 = vpop.f32.mrf.mxu0 }
 0x24d   : > { %v1262_v45 = vadd.f32 %v1586_v48, %v2641_v34  ;;  %v1625_v36 = vpop.f32.mrf.mxu1 }
 0x24e   : > { %v1626_v53 = vadd.f32 %v1625_v36, %v1624_v40  ;;  %v1588_v8 = vpop.f32.mrf.mxu0 }
 0x24f   : > { %v1627_v51 = vpop.f32.mrf.mxu1  ;;  %v1589_v10 = vadd.f32 %v1588_v8, %v1587_v43 }
 0x250   : > { %v1327_v38 = vadd.f32 %v1626_v53, %v1262_v45 }
 0x251   : > { %v1265_v17 = vadd.f32 %v1589_v10, %v2641_v34  ;;  %v1628_v22 = vpop.f32.mrf.mxu1 }
 0x252   : > { %1357 = vst [vmem:[%s2647_s15] sm:$0xff] %v1327_v38  ;;  %v1629_v26 = vadd.f32 %v1628_v22, %v1627_v51 }
 0x253   : > { %v1590_v59 = vpop.f32.mrf.mxu0 }
 0x254   : > { %v1330_v21 = vadd.f32 %v1629_v26, %v1265_v17 }
 0x255   : > { %v1630_v19 = vpop.f32.mrf.mxu1  ;;  %v1591_v62 = vpop.f32.mrf.mxu0 }
 0x256   : > { %1358 = vst [vmem:[%s2647_s15 + $0x8] sm:$0xff] %v1330_v21  ;;  %v1592_v9 = vadd.f32 %v1591_v62, %v1590_v59 }
 0x257   : > { %v1631_v7 = vpop.f32.mrf.mxu1  ;;  %v1593_v29 = vpop.f32.mrf.mxu0 }
 0x258   : > { %v1270_v50 = vadd.f32 %v1592_v9, %v2641_v34  ;;  %v1632_v41 = vadd.f32 %v1631_v7, %v1630_v19 }
 0x259   : > { %v1633_v60 = vpop.f32.mrf.mxu1  ;;  %v1594_v56 = vpop.f32.mrf.mxu0 }
 0x25a   : > { %v1335_v18 = vadd.f32 %v1632_v41, %v1270_v50  ;;  %v1595_v14 = vadd.f32 %v1594_v56, %v1593_v29 }
 0x25b   : > { %v1634_v39 = vpop.f32.mrf.mxu1  ;;  %v1596_v35 = vpop.f32.mrf.mxu0 }
 0x25c   : > { %1359 = vst [vmem:[%s2647_s15 + $0x10] sm:$0xff] %v1335_v18  ;;  %v1273_v12 = vadd.f32 %v1595_v14, %v2641_v34  ;;  %v1635_v33 = vadd.f32 %v1634_v39, %v1633_v60 }
 0x25d   : > { %v1597_v3 = vpop.f32.mrf.mxu0 }
 0x25e   : > { %v1338_v28 = vadd.f32 %v1635_v33, %v1273_v12  ;;  %v1598_v37 = vadd.f32 %v1597_v3, %v1596_v35 }
 0x25f   : > { %v1636_v49 = vpop.f32.mrf.mxu1  ;;  %v1599_v24 = vpop.f32.mrf.mxu0 }
 0x260   : > { %1360 = vst [vmem:[%s2647_s15 + $0x18] sm:$0xff] %v1338_v28  ;;  %v1278_v58 = vadd.f32 %v1598_v37, %v2641_v34 }
 0x261   : > { %v1637_v31 = vpop.f32.mrf.mxu1  ;;  %v1600_v55 = vpop.f32.mrf.mxu0 }
 0x262   : > { %v1638_v0 = vadd.f32 %v1637_v31, %v1636_v49  ;;  %v1601_v61 = vadd.f32 %v1600_v55, %v1599_v24 }
 0x263   : > { %v1639_v44 = vpop.f32.mrf.mxu1 }
 0x264   : > { %v1343_v30 = vadd.f32 %v1638_v0, %v1278_v58  ;;  %v1281_v5 = vadd.f32 %v1601_v61, %v2641_v34 }
 0x265   : > { %v1640_v47 = vpop.f32.mrf.mxu1 }
 0x266   : > { %1361 = vst [vmem:[%s2647_s15 + $0x20] sm:$0xff] %v1343_v30  ;;  %v1641_v20 = vadd.f32 %v1640_v47, %v1639_v44 }
 0x268   : > { %v1346_v54 = vadd.f32 %v1641_v20, %v1281_v5 }
 0x26a   : > { %1362 = vst [vmem:[%s2647_s15 + $0x28] sm:$0xff] %v1346_v54 }
 0x26d   : > { %v1602_v27 = vpop.f32.mrf.mxu0 }
 0x26f   : > { %v1642_v11 = vpop.f32.mrf.mxu1  ;;  %v1603_v46 = vpop.f32.mrf.mxu0 }
 0x270   : > { %v1604_v25 = vadd.f32 %v1603_v46, %v1602_v27 }
 0x271   : > { %v1643_v52 = vpop.f32.mrf.mxu1  ;;  %v1605_v13 = vpop.f32.mrf.mxu0 }
 0x272   : > { %v1286_v32 = vadd.f32 %v1604_v25, %v2641_v34  ;;  %v1644_v57 = vadd.f32 %v1643_v52, %v1642_v11 }
 0x273   : > { %v1645_v63 = vpop.f32.mrf.mxu1  ;;  %v1606_v15 = vpop.f32.mrf.mxu0 }
 0x274   : > { %v1351_v6 = vadd.f32 %v1644_v57, %v1286_v32  ;;  %v1607_v1 = vadd.f32 %v1606_v15, %v1605_v13 }
 0x275   : > { %v1646_v4 = vpop.f32.mrf.mxu1 }
 0x276   : > { %1363 = vst [vmem:[%s2647_s15 + $0x30] sm:$0xff] %v1351_v6  ;;  %v1289_v23 = vadd.f32 %v1607_v1, %v2641_v34  ;;  %v1647_v16 = vadd.f32 %v1646_v4, %v1645_v63 }
 0x278   : > { %v1354_v42 = vadd.f32 %v1647_v16, %v1289_v23 }
 0x27a   : > { %1364 = vst [vmem:[%s2647_s15 + $0x38] sm:$0xff] %v1354_v42 }
 0x27b   : > { %1997 = shalt.err (!%p1994_p9)
}
 0x27c   : > { %s1998_s9 = scalar_lea.hbm %s2669_s13, 1024  ;;  %s2002_s24 = scalar_lea.hbm %s2718_s5, 2048 }
 0x27d   : > { %p1999_p1 = scmp.ne.s32.totalorder %s2669_s13, %s1998_s9  ;;  %p2003_p11 = scmp.lt.s32.totalorder %s2669_s13, %s2718_s5 }
 0x27e   : > { %p2004_p13 = scmp.lt.s32.totalorder %s2002_s24, %s1998_s9 }
 0x27f   : > { %p2000_p8 = pnand %p1999_p1, %p2766_p6 }
 0x280   : > { %p2005_p2 = por %p2004_p13, %p2003_p11 }
 0x281   : > { %p2001_p10 = pneg %p2000_p8 }
 0x283   : > { %p2006_p4 = pnand %p2005_p2, %p2001_p10 }
 0x285   : > { %2009 = shalt.err (!%p2006_p4)
}
 0x286   : > { %s2070_s23 = smov 128   ;;  %s2071_s27 = smov 8  }
 0x287   : > { %1662 = dma.vmem_to_hbm [thread:$0]  (%p2766_p6), %s2662_s17, 1024, %s2669_s13, %s1366_s14, %s2070_s23, %s2070_s23, %s2071_s27  }
 0x288 PF: > { %s1394_s29 = sand.u32 1, %s2044_s18   ;;  %p2767_p12 = scmp.ne.s32.totalorder %s2732_s25, 0 }
 0x289   : > { %p2768_p0 = scmp.ge.s32.totalorder %s2056_s21, 2  ;;  %s1395_s16 = scalar_lea.sflag [#allocation4], %s1394_s29 }
 0x28b   : > { %p1679_p5 = pnand %p2768_p0, %p2767_p12 }
 0x28d   : > { %p1680_p3 = pneg %p1679_p5 }
 0x28f   : > { %2039 = dma.done.wait (%p1680_p3), %s1395_s16, 1024  }
 0x290   : > { %2041 = vsyncadd (%p1680_p3), %s1395_s16, 4294966272  ;;  %p20_p7 = scmp.ge.s32.totalorder %s2182_s6, 4   ;;  %s2769_s18 = smov %s2048_s19 }
 0x291   : > { %s2770_s19 = smov %s2052_s20  ;;  %s2771_s20 = smov %s2192_s10 }
 0x292   : > { %s2772_s21 = smov %s2182_s6  ;;  %22 = sbr.rel (!%p20_p7) target bundleno = 7 (0x7), region = 97 }
 0x297   :  { %1400 = vsyncpa [#allocation3], 1 }
 0x298   :  { %1402 = vsyncpa [#allocation3 + $0x1], 1 }
 0x299   :  { %1403 = vsyncpa [#allocation6], 1 }
 0x29a   :  { %1404 = vsyncpa [#allocation9], 1 }
 0x29b   :  { %1405 = vsyncpa [#allocation4], 1 }
 0x29c   :  { %1407 = vsyncpa [#allocation4 + $0x1], 1 }

</bundles_post_ra>
